<compile_context>
chip_gen: v6e
topology: v6e:2x2x1
jax: 0.10.0
libtpu: 0.0.40
codegen_flags: <defaults>
</compile_context>

<pallas_src>
import math

import jax
import jax.numpy as jnp
from jax.experimental import pallas as pl
from jax.experimental.pallas import tpu as pltpu


# ---------------------------------------------------------------------------
# small helpers (weight packing, specs)
# ---------------------------------------------------------------------------

def _wspec(arr):
    """Full-array (broadcast) BlockSpec for a weight input."""
    rank = arr.ndim
    return pl.BlockSpec(arr.shape, lambda n, _r=rank: (0,) * _r)


def _group_map(C, G):
    """(C, G) one-hot group-membership matrix for matmul-based GroupNorm statistics."""
    return (jnp.arange(C)[:, None] // (C // G) == jnp.arange(G)[None, :]).astype(jnp.float32)


def _subpixel_weights(wt):
    """Rearrange ConvTranspose2d(C,C,4,2,1) weight (Cin, Cout, 4, 4) into 4 sub-pixel 2x2
    conv matrices of shape (4, 4*Cin, Cout).  Class c = 2*(oh%2) + (ow%2); taps stacked
    along the contraction dim in the same order the kernel builds its im2col columns."""
    k_sets = {0: (1, 3), 1: (0, 2)}        # output parity -> contributing kernel taps
    mats = []
    for ph in (0, 1):
        for pw in (0, 1):
            taps = [wt[:, :, kh, kw] for kh in k_sets[ph] for kw in k_sets[pw]]
            mats.append(jnp.concatenate(taps, axis=0))          # (4*Cin, Cout)
    return jnp.stack(mats, axis=0)                              # (4, 4*Cin, Cout)


def pack_params(params, cfg):
    """Precompute kernel-side weight layouts once (outside the forward pass)."""
    G = cfg['norm_channels']
    nh = cfg['num_heads']
    Cin, Cout = cfg['in_channels'], cfg['out_channels']
    packed = {}
    if cfg['up_sample']:
        packed['up_w'] = _subpixel_weights(params['up_w'])
        packed['up_b'] = params['up_b'].reshape(1, -1)
    layers = []
    for i, p in enumerate(params['layers']):
        ci = Cin if i == 0 else Cout
        co = Cout
        q = dict(
            gn1_g=p['gn1_g'].reshape(1, ci), gn1_b=p['gn1_b'].reshape(1, ci),
            gm_i=_group_map(ci, G), gmt_i=_group_map(ci, G).T,
            w1=p['conv1_w'].reshape(9 * ci, co), b1=p['conv1_b'].reshape(1, co),
            gn2_g=p['gn2_g'].reshape(1, co), gn2_b=p['gn2_b'].reshape(1, co),
            gm_o=_group_map(co, G), gmt_o=_group_map(co, G).T,
            w2=p['conv2_w'].reshape(9 * co, co), b2=p['conv2_b'].reshape(1, co),
            res_w=p['res_w'].reshape(ci, co), res_b=p['res_b'].reshape(1, co),
        )
        if cfg['t_emb_dim'] is not None:
            q['t_w'] = p['t_w']
            q['t_b'] = p['t_b'].reshape(1, co)
        if cfg['attn']:
            dh = co // nh
            q['agn_g'] = p['agn_g'].reshape(1, co)
            q['agn_b'] = p['agn_b'].reshape(1, co)
            # in_w stored as (C, 3C) == W_in.T; rearrange to (3, heads, C, dh)
            q['qkv_w'] = jnp.transpose(p['in_w'].reshape(co, 3, nh, dh), (1, 2, 0, 3))
            q['qkv_b'] = p['in_b'].reshape(3, nh, 1, dh)
            q['ow'] = p['out_w'].reshape(nh, dh, co)            # W_out.T split by head rows
            q['ob'] = p['out_b'].reshape(1, co)
        layers.append(q)
    packed['layers'] = layers
    return packed


# ---------------------------------------------------------------------------
# fused resnet(+attention) layer kernel
# ---------------------------------------------------------------------------

def _make_layer_kernel(H, W, Ci, Co, G, nh, has_t, has_attn, eps=1e-5):
    L = H * W
    dh = (Co // nh) if has_attn else 1
    scale = 1.0 / math.sqrt(dh)

    def kernel(*refs):
        refs = list(refs)

        def take():
            return refs.pop(0)

        x_ref = take()
        gn1g = take(); gn1b = take(); gmi = take(); gmti = take()
        w1 = take(); b1 = take()
        if has_t:
            t_ref = take(); tw = take(); tb = take()
        gn2g = take(); gn2b = take(); gmo = take(); gmto = take()
        w2 = take(); b2 = take()
        rw = take(); rb = take()
        if has_attn:
            agng = take(); agnb = take()
            qkvw = take(); qkvb = take(); oww = take(); owb = take()
        o_ref = take()
        pad = take()                                             # VMEM scratch (H+2, W+16, Cmax)

        def gnorm(x, gamma, beta, gmap, gmapt, C, act):
            """GroupNorm over (L, C) with centered (two-pass) variance; optional fused SiLU."""
            inv_cnt = 1.0 / float(L * (C // G))
            s = jnp.sum(x, axis=0, keepdims=True)                                   # (1, C)
            mean_g = jnp.dot(s, gmap, preferred_element_type=jnp.float32) * inv_cnt  # (1, G)
            mean_c = jnp.dot(mean_g, gmapt, preferred_element_type=jnp.float32)      # (1, C)
            xc = x - mean_c
            ssq = jnp.sum(xc * xc, axis=0, keepdims=True)
            var_g = jnp.dot(ssq, gmap, preferred_element_type=jnp.float32) * inv_cnt
            var_c = jnp.dot(var_g, gmapt, preferred_element_type=jnp.float32)
            y = xc * jax.lax.rsqrt(var_c + eps)
            y = y * gamma + beta
            if act:
                y = y * jax.nn.sigmoid(y)
            return y

        def conv3x3(h, w_flat, C):
            """3x3 / pad=1 conv as one im2col matmul (contraction 9*C).
            The interior is written at sublane offset 8 so the scratch store is tile-aligned."""
            csl = slice(None) if C == pad.shape[2] else slice(0, C)
            pad[...] = jnp.zeros(pad.shape, jnp.float32)
            pad[1:1 + H, 8:8 + W, csl] = h.reshape(H, W, C)
            cols = []
            for ki in range(3):
                for kj in range(3):
                    cols.append(pad[ki:ki + H, 7 + kj:7 + kj + W, csl].reshape(L, C))
            patches = jnp.concatenate(cols, axis=-1)                                 # (L, 9*C)
            return jnp.dot(patches, w_flat, preferred_element_type=jnp.float32)

        x = x_ref[0].reshape(L, Ci)

        # resnet_conv_first: GN + SiLU + conv3x3 (+ fused time-embedding projection)
        h1 = gnorm(x, gn1g[...], gn1b[...], gmi[...], gmti[...], Ci, act=True)
        y1 = conv3x3(h1, w1[...], Ci) + b1[...]
        if has_t:
            tv = t_ref[...]
            tv = tv * jax.nn.sigmoid(tv)                                             # SiLU
            y1 = y1 + jnp.dot(tv, tw[...], preferred_element_type=jnp.float32) + tb[...]

        # resnet_conv_second: GN + SiLU + conv3x3
        h2 = gnorm(y1, gn2g[...], gn2b[...], gmo[...], gmto[...], Co, act=True)
        y2 = conv3x3(h2, w2[...], Co) + b2[...]

        # 1x1 residual conv on the layer input
        out = y2 + jnp.dot(x, rw[...], preferred_element_type=jnp.float32) + rb[...]

        if has_attn:
            a = gnorm(out, agng[...], agnb[...], gmo[...], gmto[...], Co, act=False)
            acc = None
            for hd in range(nh):
                q = jnp.dot(a, qkvw[0, hd], preferred_element_type=jnp.float32) + qkvb[0, hd]
                k = jnp.dot(a, qkvw[1, hd], preferred_element_type=jnp.float32) + qkvb[1, hd]
                v = jnp.dot(a, qkvw[2, hd], preferred_element_type=jnp.float32) + qkvb[2, hd]
                s = jax.lax.dot_general(q, k, (((1,), (1,)), ((), ())),
                                        preferred_element_type=jnp.float32) * scale
                m = jnp.max(s, axis=-1, keepdims=True)
                p = jnp.exp(s - m)
                denom = jnp.sum(p, axis=-1, keepdims=True)
                p = p * pl.reciprocal(denom, approx=True)
                ctx = jnp.dot(p, v, preferred_element_type=jnp.float32)              # (L, dh)
                contrib = jnp.dot(ctx, oww[hd], preferred_element_type=jnp.float32)  # (L, Co)
                acc = contrib if acc is None else acc + contrib
            out = out + acc + owb[...]                       # fused out-proj bias + residual

        o_ref[0] = out

    return kernel


def fused_layer(x_nhwc, q, t_emb, cfg):
    N, H, W, Ci = x_nhwc.shape
    Co = q['b1'].shape[1]
    G = cfg['norm_channels']
    nh = cfg['num_heads']
    has_t = cfg['t_emb_dim'] is not None
    has_attn = bool(cfg['attn'])
    L = H * W
    Cmax = max(Ci, Co)

    inputs = [x_nhwc, q['gn1_g'], q['gn1_b'], q['gm_i'], q['gmt_i'], q['w1'], q['b1']]
    in_specs = [pl.BlockSpec((1, H, W, Ci), lambda n: (n, 0, 0, 0))]
    in_specs += [_wspec(a) for a in inputs[1:]]
    if has_t:
        T = t_emb.shape[1]
        inputs += [t_emb, q['t_w'], q['t_b']]
        in_specs += [pl.BlockSpec((1, T), lambda n: (n, 0)),
                     _wspec(q['t_w']), _wspec(q['t_b'])]
    tail = [q['gn2_g'], q['gn2_b'], q['gm_o'], q['gmt_o'], q['w2'], q['b2'],
            q['res_w'], q['res_b']]
    inputs += tail
    in_specs += [_wspec(a) for a in tail]
    if has_attn:
        attn_in = [q['agn_g'], q['agn_b'], q['qkv_w'], q['qkv_b'], q['ow'], q['ob']]
        inputs += attn_in
        in_specs += [_wspec(a) for a in attn_in]

    kernel = _make_layer_kernel(H, W, Ci, Co, G, nh, has_t, has_attn)
    out = pl.pallas_call(
        kernel,
        out_shape=jax.ShapeDtypeStruct((N, L, Co), jnp.float32),
        grid=(N,),
        in_specs=in_specs,
        out_specs=pl.BlockSpec((1, L, Co), lambda n: (n, 0, 0)),
        scratch_shapes=[pltpu.VMEM((H + 2, W + 16, Cmax), jnp.float32)],
        compiler_params=pltpu.CompilerParams(dimension_semantics=("parallel",)),
    )(*inputs)
    return out.reshape(N, H, W, Co)


# ---------------------------------------------------------------------------
# sub-pixel ConvTranspose2d(C, C, 4, 2, 1) kernel
# ---------------------------------------------------------------------------

def _make_upsample_kernel(H, W, C):
    L = H * W
    offs = {0: (0, -1), 1: (1, 0)}      # output parity -> input offsets (matches weight order)

    def kernel(xp_ref, w_ref, b_ref, o_ref):
        for c, (ph, pw) in enumerate(((0, 0), (0, 1), (1, 0), (1, 1))):
            cols = []
            for dr in offs[ph]:
                for dc in offs[pw]:
                    cols.append(
                        xp_ref[0, 1 + dr:1 + dr + H, 1 + dc:1 + dc + W, :].reshape(L, C))
            patches = jnp.concatenate(cols, axis=-1)                                 # (L, 4*C)
            o_ref[0, c] = (jnp.dot(patches, w_ref[c], preferred_element_type=jnp.float32)
                           + b_ref[...])

    return kernel


def conv_transpose2d_subpixel(x_nhwc, wsub, b2d):
    """ConvTranspose2d(C, C, 4, 2, 1) via sub-pixel decomposition: 4 x (2x2 conv on the
    low-res input), then a plain-JAX pixel-shuffle interleave (no zero-upsampling)."""
    N, H, W, C = x_nhwc.shape
    xp = jnp.pad(x_nhwc, ((0, 0), (1, 1), (1, 1), (0, 0)))
    y4 = pl.pallas_call(
        _make_upsample_kernel(H, W, C),
        out_shape=jax.ShapeDtypeStruct((N, 4, H * W, C), jnp.float32),
        grid=(N,),
        in_specs=[
            pl.BlockSpec((1, H + 2, W + 2, C), lambda n: (n, 0, 0, 0)),
            pl.BlockSpec(wsub.shape, lambda n: (0, 0, 0)),
            pl.BlockSpec((1, C), lambda n: (0, 0)),
        ],
        out_specs=pl.BlockSpec((1, 4, H * W, C), lambda n: (n, 0, 0, 0)),
        compiler_params=pltpu.CompilerParams(dimension_semantics=("parallel",)),
    )(xp, wsub, b2d)
    y = y4.reshape(N, 2, 2, H, W, C)                                   # pixel-shuffle (glue)
    y = jnp.transpose(y, (0, 3, 1, 4, 2, 5)).reshape(N, 2 * H, 2 * W, C)
    return y


# ---------------------------------------------------------------------------
# UpBlock forward (Pallas)
# ---------------------------------------------------------------------------

def up_block_forward(packed, x_nchw, out_down=None, t_emb=None, *, cfg):
    x = jnp.transpose(x_nchw, (0, 2, 3, 1)).astype(jnp.float32)        # NCHW -> NHWC
    if cfg['up_sample']:
        x = conv_transpose2d_subpixel(x, packed['up_w'], packed['up_b'])
    if out_down is not None:
        x = jnp.concatenate([x, jnp.transpose(out_down, (0, 2, 3, 1))], axis=-1)
    out = x
    for i in range(cfg['num_layers']):
        out = fused_layer(out, packed['layers'][i], t_emb, cfg)
    return jnp.transpose(out, (0, 3, 1, 2))                            # NHWC -> NCHW


# ---------------------------------------------------------------------------
# Pure-JAX reference (NCHW, mirrors the PyTorch forward) for self-checking
# ---------------------------------------------------------------------------

def _silu(x):
    return x * jax.nn.sigmoid(x)


def ref_group_norm(x, gamma, beta, groups, eps=1e-5):
    N, C = x.shape[:2]
    sp = x.shape[2:]
    xg = x.reshape(N, groups, -1)
    mean = xg.mean(-1, keepdims=True)
    var = xg.var(-1, keepdims=True)
    xn = ((xg - mean) / jnp.sqrt(var + eps)).reshape(x.shape)
    g = gamma.reshape((1, C) + (1,) * len(sp))
    b = beta.reshape((1, C) + (1,) * len(sp))
    return xn * g + b


def ref_conv2d(x, w_hwio, b, pad):
    w = jnp.transpose(w_hwio, (3, 2, 0, 1))                            # OIHW
    y = jax.lax.conv_general_dilated(
        x, w, (1, 1), ((pad, pad), (pad, pad)),
        dimension_numbers=('NCHW', 'OIHW', 'NCHW'),
        precision=jax.lax.Precision.HIGHEST)
    return y + b.reshape(1, -1, 1, 1)


def ref_conv_transpose2d(x, wt, b, K=4, S=2, P=1):
    w = jnp.transpose(jnp.flip(wt, (2, 3)), (1, 0, 2, 3))              # OIHW (O=Cout)
    y = jax.lax.conv_general_dilated(
        x, w, (1, 1), ((K - 1 - P, K - 1 - P), (K - 1 - P, K - 1 - P)),
        lhs_dilation=(S, S), dimension_numbers=('NCHW', 'OIHW', 'NCHW'),
        precision=jax.lax.Precision.HIGHEST)
    return y + b.reshape(1, -1, 1, 1)


def ref_attention(x_nlc, in_w, in_b, out_w, out_b, num_heads):
    N, L, C = x_nlc.shape
    dh = C // num_heads
    qkv = x_nlc @ in_w + in_b
    q, k, v = qkv[..., :C], qkv[..., C:2 * C], qkv[..., 2 * C:]
    sh = lambda t: jnp.transpose(t.reshape(N, L, num_heads, dh), (0, 2, 1, 3))
    q, k, v = sh(q), sh(k), sh(v)
    s = jnp.einsum('nhld,nhmd->nhlm', q, k,
                   precision=jax.lax.Precision.HIGHEST) / math.sqrt(dh)
    p = jax.nn.softmax(s, axis=-1)
    o = jnp.einsum('nhlm,nhmd->nhld', p, v, precision=jax.lax.Precision.HIGHEST)
    o = jnp.transpose(o, (0, 2, 1, 3)).reshape(N, L, C)
    return o @ out_w + out_b


def ref_forward(params, x, out_down, t_emb, cfg):
    if cfg['up_sample']:
        x = ref_conv_transpose2d(x, params['up_w'], params['up_b'])
    if out_down is not None:
        x = jnp.concatenate([x, out_down], axis=1)
    out = x
    for i in range(cfg['num_layers']):
        p = params['layers'][i]
        resnet_input = out
        h = _silu(ref_group_norm(out, p['gn1_g'], p['gn1_b'], cfg['norm_channels']))
        h = ref_conv2d(h, p['conv1_w'], p['conv1_b'], pad=1)
        if cfg['t_emb_dim'] is not None:
            te = _silu(t_emb) @ p['t_w'] + p['t_b']
            h = h + te[:, :, None, None]
        h2 = _silu(ref_group_norm(h, p['gn2_g'], p['gn2_b'], cfg['norm_channels']))
        h2 = ref_conv2d(h2, p['conv2_w'], p['conv2_b'], pad=1)
        res = ref_conv2d(resnet_input, p['res_w'], p['res_b'], pad=0)
        out = h2 + res
        if cfg['attn']:
            N, C, H, W = out.shape
            a = out.reshape(N, C, H * W)
            a = ref_group_norm(a, p['agn_g'], p['agn_b'], cfg['norm_channels'])
            a = jnp.transpose(a, (0, 2, 1))
            a = ref_attention(a, p['in_w'], p['in_b'], p['out_w'], p['out_b'], cfg['num_heads'])
            a = jnp.transpose(a, (0, 2, 1)).reshape(N, C, H, W)
            out = out + a
    return out


# ---------------------------------------------------------------------------
# Deterministic parameter init (synthetic weights; shapes follow the module)
# ---------------------------------------------------------------------------

def init_params(key, cfg):
    cnt = [0]

    def rnd(shape, scale=0.1):
        cnt[0] += 1
        return scale * jax.random.normal(jax.random.fold_in(key, cnt[0]), shape, dtype=jnp.float32)

    Cin, Cout = cfg['in_channels'], cfg['out_channels']
    params = {}
    if cfg['up_sample']:
        params['up_w'] = rnd((Cin, Cin, 4, 4))      # ConvTranspose2d weight (in, out, kH, kW)
        params['up_b'] = rnd((Cin,), 0.05)
    layers = []
    for i in range(cfg['num_layers']):
        ci = Cin if i == 0 else Cout
        p = dict(
            gn1_g=1.0 + rnd((ci,)), gn1_b=rnd((ci,)),
            conv1_w=rnd((3, 3, ci, Cout)), conv1_b=rnd((Cout,), 0.05),
            gn2_g=1.0 + rnd((Cout,)), gn2_b=rnd((Cout,)),
            conv2_w=rnd((3, 3, Cout, Cout)), conv2_b=rnd((Cout,), 0.05),
            res_w=rnd((1, 1, ci, Cout)), res_b=rnd((Cout,), 0.05),
        )
        if cfg['t_emb_dim'] is not None:
            p['t_w'] = rnd((cfg['t_emb_dim'], Cout))
            p['t_b'] = rnd((Cout,), 0.05)
        if cfg['attn']:
            p['agn_g'] = 1.0 + rnd((Cout,))
            p['agn_b'] = rnd((Cout,))
            p['in_w'] = rnd((Cout, 3 * Cout))       # stored as (C, 3C) == W_in.T
            p['in_b'] = rnd((3 * Cout,), 0.05)
            p['out_w'] = rnd((Cout, Cout))          # stored as W_out.T
            p['out_b'] = rnd((Cout,), 0.05)
        layers.append(p)
    params['layers'] = layers
    return params


# ---------------------------------------------------------------------------

if __name__ == "__main__":
    cfg = dict(in_channels=8, out_channels=8, t_emb_dim=16, up_sample=True,
               num_heads=2, num_layers=2, attn=True, norm_channels=4)

    root = jax.random.PRNGKey(0)
    kp, kx, kt = jax.random.split(root, 3)
    params = init_params(kp, cfg)

    # x is NCHW; out_down=None keeps the channel arithmetic of this module version
    # consistent (concat + GroupNorm(in_channels)).
    x = jax.random.normal(kx, (2, cfg['in_channels'], 8, 8), dtype=jnp.float32)
    t_emb = jax.random.normal(kt, (2, cfg['t_emb_dim']), dtype=jnp.float32)

    packed = pack_params(params, cfg)                 # one-time weight layout packing
    out = up_block_forward(packed, x, None, t_emb, cfg=cfg)
    out = jax.block_until_ready(out)

    ref = ref_forward(params, x, None, t_emb, cfg)
    assert out.shape == ref.shape == (2, cfg['out_channels'], 16, 16), (out.shape, ref.shape)
    err = float(jnp.max(jnp.abs(out - ref)))
    scale = max(1.0, float(jnp.max(jnp.abs(ref))))
    assert err < 2e-2 * scale, f"mismatch: max abs err {err} (scale {scale})"

    print("KERNEL_OK")
</pallas_src>

<mosaic_0001>
module attributes {stable_mosaic.version = 11 : i64} {
  func.func @kernel(%arg0: i32, %arg1: memref<1x10x10x8xf32, #tpu.memory_space<vmem>>, %arg2: memref<4x32x8xf32, #tpu.memory_space<vmem>>, %arg3: memref<1x8xf32, #tpu.memory_space<vmem>>, %arg4: memref<1x4x64x8xf32, #tpu.memory_space<vmem>>) attributes {dimension_semantics = [#tpu.dimension_semantics<parallel>], iteration_bounds = array<i64: 2>, scalar_prefetch = 0 : i64, scratch_operands = 0 : i64, tpu.core_type = #tpu.core_type<tc>, window_params = [{transform_indices = @transform_0, window_bounds = array<i64: 1, 10, 10, 8>}, {pipeline_mode = #tpu.pipeline_mode<synchronous>, transform_indices = @transform_1, window_bounds = array<i64: 4, 32, 8>}, {pipeline_mode = #tpu.pipeline_mode<synchronous>, transform_indices = @transform_2, window_bounds = array<i64: 1, 8>}, {transform_indices = @transform_3, window_bounds = array<i64: 1, 4, 64, 8>}]} {
    %c0 = arith.constant 0 : index
    %c1 = arith.constant 1 : index
    %c1_0 = arith.constant 1 : index
    %c0_1 = arith.constant 0 : index
    %0 = vector.load %arg1[%c0, %c1, %c1_0, %c0_1] : memref<1x10x10x8xf32, #tpu.memory_space<vmem>>, vector<1x8x8x8xf32>
    %1 = vector.shape_cast %0 : vector<1x8x8x8xf32> to vector<8x8x8xf32>
    %2 = vector.shape_cast %1 : vector<8x8x8xf32> to vector<64x8xf32>
    %c0_2 = arith.constant 0 : index
    %c1_3 = arith.constant 1 : index
    %c0_4 = arith.constant 0 : index
    %c0_5 = arith.constant 0 : index
    %3 = vector.load %arg1[%c0_2, %c1_3, %c0_4, %c0_5] : memref<1x10x10x8xf32, #tpu.memory_space<vmem>>, vector<1x8x8x8xf32>
    %4 = vector.shape_cast %3 : vector<1x8x8x8xf32> to vector<8x8x8xf32>
    %5 = vector.shape_cast %4 : vector<8x8x8xf32> to vector<64x8xf32>
    %c0_6 = arith.constant 0 : index
    %c0_7 = arith.constant 0 : index
    %c1_8 = arith.constant 1 : index
    %c0_9 = arith.constant 0 : index
    %6 = vector.load %arg1[%c0_6, %c0_7, %c1_8, %c0_9] : memref<1x10x10x8xf32, #tpu.memory_space<vmem>>, vector<1x8x8x8xf32>
    %7 = vector.shape_cast %6 : vector<1x8x8x8xf32> to vector<8x8x8xf32>
    %8 = vector.shape_cast %7 : vector<8x8x8xf32> to vector<64x8xf32>
    %c0_10 = arith.constant 0 : index
    %c0_11 = arith.constant 0 : index
    %c0_12 = arith.constant 0 : index
    %c0_13 = arith.constant 0 : index
    %9 = vector.load %arg1[%c0_10, %c0_11, %c0_12, %c0_13] : memref<1x10x10x8xf32, #tpu.memory_space<vmem>>, vector<1x8x8x8xf32>
    %10 = vector.shape_cast %9 : vector<1x8x8x8xf32> to vector<8x8x8xf32>
    %11 = vector.shape_cast %10 : vector<8x8x8xf32> to vector<64x8xf32>
    %12 = tpu.concatenate %2, %5, %8, %11 in 1 : vector<64x8xf32>, vector<64x8xf32>, vector<64x8xf32>, vector<64x8xf32> -> vector<64x32xf32>
    %c0_14 = arith.constant 0 : index
    %c0_15 = arith.constant 0 : index
    %c0_16 = arith.constant 0 : index
    %13 = vector.load %arg2[%c0_14, %c0_15, %c0_16] : memref<4x32x8xf32, #tpu.memory_space<vmem>>, vector<1x32x8xf32>
    %14 = vector.shape_cast %13 : vector<1x32x8xf32> to vector<32x8xf32>
    %cst = arith.constant dense<0.000000e+00> : vector<64x8xf32>
    %15 = tpu.matmul %12, %14, %cst {dimension_numbers = #tpu.dot_dimension_numbers<[1], [0], [0], [1], [0, 0, 1, 1], [], []>} : vector<64x32xf32>, vector<32x8xf32>, vector<64x8xf32> -> vector<64x8xf32>
    %c0_17 = arith.constant 0 : index
    %c0_18 = arith.constant 0 : index
    %16 = vector.load %arg3[%c0_17, %c0_18] : memref<1x8xf32, #tpu.memory_space<vmem>>, vector<1x8xf32>
    %17 = vector.broadcast %16 : vector<1x8xf32> to vector<64x8xf32>
    %18 = arith.addf %15, %17 : vector<64x8xf32>
    %c0_19 = arith.constant 0 : index
    %c0_20 = arith.constant 0 : index
    %c0_21 = arith.constant 0 : index
    %c0_22 = arith.constant 0 : index
    %19 = vector.load %arg4[%c0_19, %c0_20, %c0_21, %c0_22] : memref<1x4x64x8xf32, #tpu.memory_space<vmem>>, vector<1x1x64x8xf32>
    %20 = vector.shape_cast %19 : vector<1x1x64x8xf32> to vector<64x8xf32>
    %21 = vector.shape_cast %18 : vector<64x8xf32> to vector<1x1x64x8xf32>
    tpu.vector_store %arg4[%c0_19, %c0_20, %c0_21, %c0_22], %21 {strides = array<i32>} : memref<1x4x64x8xf32, #tpu.memory_space<vmem>>, vector<1x1x64x8xf32>,
    %c0_23 = arith.constant 0 : index
    %c1_24 = arith.constant 1 : index
    %c2 = arith.constant 2 : index
    %c0_25 = arith.constant 0 : index
    %22 = vector.load %arg1[%c0_23, %c1_24, %c2, %c0_25] : memref<1x10x10x8xf32, #tpu.memory_space<vmem>>, vector<1x8x8x8xf32>
    %23 = vector.shape_cast %22 : vector<1x8x8x8xf32> to vector<8x8x8xf32>
    %24 = vector.shape_cast %23 : vector<8x8x8xf32> to vector<64x8xf32>
    %c0_26 = arith.constant 0 : index
    %c1_27 = arith.constant 1 : index
    %c1_28 = arith.constant 1 : index
    %c0_29 = arith.constant 0 : index
    %25 = vector.load %arg1[%c0_26, %c1_27, %c1_28, %c0_29] : memref<1x10x10x8xf32, #tpu.memory_space<vmem>>, vector<1x8x8x8xf32>
    %26 = vector.shape_cast %25 : vector<1x8x8x8xf32> to vector<8x8x8xf32>
    %27 = vector.shape_cast %26 : vector<8x8x8xf32> to vector<64x8xf32>
    %c0_30 = arith.constant 0 : index
    %c0_31 = arith.constant 0 : index
    %c2_32 = arith.constant 2 : index
    %c0_33 = arith.constant 0 : index
    %28 = vector.load %arg1[%c0_30, %c0_31, %c2_32, %c0_33] : memref<1x10x10x8xf32, #tpu.memory_space<vmem>>, vector<1x8x8x8xf32>
    %29 = vector.shape_cast %28 : vector<1x8x8x8xf32> to vector<8x8x8xf32>
    %30 = vector.shape_cast %29 : vector<8x8x8xf32> to vector<64x8xf32>
    %c0_34 = arith.constant 0 : index
    %c0_35 = arith.constant 0 : index
    %c1_36 = arith.constant 1 : index
    %c0_37 = arith.constant 0 : index
    %31 = vector.load %arg1[%c0_34, %c0_35, %c1_36, %c0_37] : memref<1x10x10x8xf32, #tpu.memory_space<vmem>>, vector<1x8x8x8xf32>
    %32 = vector.shape_cast %31 : vector<1x8x8x8xf32> to vector<8x8x8xf32>
    %33 = vector.shape_cast %32 : vector<8x8x8xf32> to vector<64x8xf32>
    %34 = tpu.concatenate %24, %27, %30, %33 in 1 : vector<64x8xf32>, vector<64x8xf32>, vector<64x8xf32>, vector<64x8xf32> -> vector<64x32xf32>
    %c1_38 = arith.constant 1 : index
    %c0_39 = arith.constant 0 : index
    %c0_40 = arith.constant 0 : index
    %35 = vector.load %arg2[%c1_38, %c0_39, %c0_40] : memref<4x32x8xf32, #tpu.memory_space<vmem>>, vector<1x32x8xf32>
    %36 = vector.shape_cast %35 : vector<1x32x8xf32> to vector<32x8xf32>
    %cst_41 = arith.constant dense<0.000000e+00> : vector<64x8xf32>
    %37 = tpu.matmul %34, %36, %cst_41 {dimension_numbers = #tpu.dot_dimension_numbers<[1], [0], [0], [1], [0, 0, 1, 1], [], []>} : vector<64x32xf32>, vector<32x8xf32>, vector<64x8xf32> -> vector<64x8xf32>
    %c0_42 = arith.constant 0 : index
    %c0_43 = arith.constant 0 : index
    %38 = vector.load %arg3[%c0_42, %c0_43] : memref<1x8xf32, #tpu.memory_space<vmem>>, vector<1x8xf32>
    %39 = vector.broadcast %38 : vector<1x8xf32> to vector<64x8xf32>
    %40 = arith.addf %37, %39 : vector<64x8xf32>
    %c0_44 = arith.constant 0 : index
    %c1_45 = arith.constant 1 : index
    %c0_46 = arith.constant 0 : index
    %c0_47 = arith.constant 0 : index
    %41 = vector.load %arg4[%c0_44, %c1_45, %c0_46, %c0_47] : memref<1x4x64x8xf32, #tpu.memory_space<vmem>>, vector<1x1x64x8xf32>
    %42 = vector.shape_cast %41 : vector<1x1x64x8xf32> to vector<64x8xf32>
    %43 = vector.shape_cast %40 : vector<64x8xf32> to vector<1x1x64x8xf32>
    tpu.vector_store %arg4[%c0_44, %c1_45, %c0_46, %c0_47], %43 {strides = array<i32>} : memref<1x4x64x8xf32, #tpu.memory_space<vmem>>, vector<1x1x64x8xf32>,
    %c0_48 = arith.constant 0 : index
    %c2_49 = arith.constant 2 : index
    %c1_50 = arith.constant 1 : index
    %c0_51 = arith.constant 0 : index
    %44 = vector.load %arg1[%c0_48, %c2_49, %c1_50, %c0_51] : memref<1x10x10x8xf32, #tpu.memory_space<vmem>>, vector<1x8x8x8xf32>
    %45 = vector.shape_cast %44 : vector<1x8x8x8xf32> to vector<8x8x8xf32>
    %46 = vector.shape_cast %45 : vector<8x8x8xf32> to vector<64x8xf32>
    %c0_52 = arith.constant 0 : index
    %c2_53 = arith.constant 2 : index
    %c0_54 = arith.constant 0 : index
    %c0_55 = arith.constant 0 : index
    %47 = vector.load %arg1[%c0_52, %c2_53, %c0_54, %c0_55] : memref<1x10x10x8xf32, #tpu.memory_space<vmem>>, vector<1x8x8x8xf32>
    %48 = vector.shape_cast %47 : vector<1x8x8x8xf32> to vector<8x8x8xf32>
    %49 = vector.shape_cast %48 : vector<8x8x8xf32> to vector<64x8xf32>
    %c0_56 = arith.constant 0 : index
    %c1_57 = arith.constant 1 : index
    %c1_58 = arith.constant 1 : index
    %c0_59 = arith.constant 0 : index
    %50 = vector.load %arg1[%c0_56, %c1_57, %c1_58, %c0_59] : memref<1x10x10x8xf32, #tpu.memory_space<vmem>>, vector<1x8x8x8xf32>
    %51 = vector.shape_cast %50 : vector<1x8x8x8xf32> to vector<8x8x8xf32>
    %52 = vector.shape_cast %51 : vector<8x8x8xf32> to vector<64x8xf32>
    %c0_60 = arith.constant 0 : index
    %c1_61 = arith.constant 1 : index
    %c0_62 = arith.constant 0 : index
    %c0_63 = arith.constant 0 : index
    %53 = vector.load %arg1[%c0_60, %c1_61, %c0_62, %c0_63] : memref<1x10x10x8xf32, #tpu.memory_space<vmem>>, vector<1x8x8x8xf32>
    %54 = vector.shape_cast %53 : vector<1x8x8x8xf32> to vector<8x8x8xf32>
    %55 = vector.shape_cast %54 : vector<8x8x8xf32> to vector<64x8xf32>
    %56 = tpu.concatenate %46, %49, %52, %55 in 1 : vector<64x8xf32>, vector<64x8xf32>, vector<64x8xf32>, vector<64x8xf32> -> vector<64x32xf32>
    %c2_64 = arith.constant 2 : index
    %c0_65 = arith.constant 0 : index
    %c0_66 = arith.constant 0 : index
    %57 = vector.load %arg2[%c2_64, %c0_65, %c0_66] : memref<4x32x8xf32, #tpu.memory_space<vmem>>, vector<1x32x8xf32>
    %58 = vector.shape_cast %57 : vector<1x32x8xf32> to vector<32x8xf32>
    %cst_67 = arith.constant dense<0.000000e+00> : vector<64x8xf32>
    %59 = tpu.matmul %56, %58, %cst_67 {dimension_numbers = #tpu.dot_dimension_numbers<[1], [0], [0], [1], [0, 0, 1, 1], [], []>} : vector<64x32xf32>, vector<32x8xf32>, vector<64x8xf32> -> vector<64x8xf32>
    %c0_68 = arith.constant 0 : index
    %c0_69 = arith.constant 0 : index
    %60 = vector.load %arg3[%c0_68, %c0_69] : memref<1x8xf32, #tpu.memory_space<vmem>>, vector<1x8xf32>
    %61 = vector.broadcast %60 : vector<1x8xf32> to vector<64x8xf32>
    %62 = arith.addf %59, %61 : vector<64x8xf32>
    %c0_70 = arith.constant 0 : index
    %c2_71 = arith.constant 2 : index
    %c0_72 = arith.constant 0 : index
    %c0_73 = arith.constant 0 : index
    %63 = vector.load %arg4[%c0_70, %c2_71, %c0_72, %c0_73] : memref<1x4x64x8xf32, #tpu.memory_space<vmem>>, vector<1x1x64x8xf32>
    %64 = vector.shape_cast %63 : vector<1x1x64x8xf32> to vector<64x8xf32>
    %65 = vector.shape_cast %62 : vector<64x8xf32> to vector<1x1x64x8xf32>
    tpu.vector_store %arg4[%c0_70, %c2_71, %c0_72, %c0_73], %65 {strides = array<i32>} : memref<1x4x64x8xf32, #tpu.memory_space<vmem>>, vector<1x1x64x8xf32>,
    %c0_74 = arith.constant 0 : index
    %c2_75 = arith.constant 2 : index
    %c2_76 = arith.constant 2 : index
    %c0_77 = arith.constant 0 : index
    %66 = vector.load %arg1[%c0_74, %c2_75, %c2_76, %c0_77] : memref<1x10x10x8xf32, #tpu.memory_space<vmem>>, vector<1x8x8x8xf32>
    %67 = vector.shape_cast %66 : vector<1x8x8x8xf32> to vector<8x8x8xf32>
    %68 = vector.shape_cast %67 : vector<8x8x8xf32> to vector<64x8xf32>
    %c0_78 = arith.constant 0 : index
    %c2_79 = arith.constant 2 : index
    %c1_80 = arith.constant 1 : index
    %c0_81 = arith.constant 0 : index
    %69 = vector.load %arg1[%c0_78, %c2_79, %c1_80, %c0_81] : memref<1x10x10x8xf32, #tpu.memory_space<vmem>>, vector<1x8x8x8xf32>
    %70 = vector.shape_cast %69 : vector<1x8x8x8xf32> to vector<8x8x8xf32>
    %71 = vector.shape_cast %70 : vector<8x8x8xf32> to vector<64x8xf32>
    %c0_82 = arith.constant 0 : index
    %c1_83 = arith.constant 1 : index
    %c2_84 = arith.constant 2 : index
    %c0_85 = arith.constant 0 : index
    %72 = vector.load %arg1[%c0_82, %c1_83, %c2_84, %c0_85] : memref<1x10x10x8xf32, #tpu.memory_space<vmem>>, vector<1x8x8x8xf32>
    %73 = vector.shape_cast %72 : vector<1x8x8x8xf32> to vector<8x8x8xf32>
    %74 = vector.shape_cast %73 : vector<8x8x8xf32> to vector<64x8xf32>
    %c0_86 = arith.constant 0 : index
    %c1_87 = arith.constant 1 : index
    %c1_88 = arith.constant 1 : index
    %c0_89 = arith.constant 0 : index
    %75 = vector.load %arg1[%c0_86, %c1_87, %c1_88, %c0_89] : memref<1x10x10x8xf32, #tpu.memory_space<vmem>>, vector<1x8x8x8xf32>
    %76 = vector.shape_cast %75 : vector<1x8x8x8xf32> to vector<8x8x8xf32>
    %77 = vector.shape_cast %76 : vector<8x8x8xf32> to vector<64x8xf32>
    %78 = tpu.concatenate %68, %71, %74, %77 in 1 : vector<64x8xf32>, vector<64x8xf32>, vector<64x8xf32>, vector<64x8xf32> -> vector<64x32xf32>
    %c3 = arith.constant 3 : index
    %c0_90 = arith.constant 0 : index
    %c0_91 = arith.constant 0 : index
    %79 = vector.load %arg2[%c3, %c0_90, %c0_91] : memref<4x32x8xf32, #tpu.memory_space<vmem>>, vector<1x32x8xf32>
    %80 = vector.shape_cast %79 : vector<1x32x8xf32> to vector<32x8xf32>
    %cst_92 = arith.constant dense<0.000000e+00> : vector<64x8xf32>
    %81 = tpu.matmul %78, %80, %cst_92 {dimension_numbers = #tpu.dot_dimension_numbers<[1], [0], [0], [1], [0, 0, 1, 1], [], []>} : vector<64x32xf32>, vector<32x8xf32>, vector<64x8xf32> -> vector<64x8xf32>
    %c0_93 = arith.constant 0 : index
    %c0_94 = arith.constant 0 : index
    %82 = vector.load %arg3[%c0_93, %c0_94] : memref<1x8xf32, #tpu.memory_space<vmem>>, vector<1x8xf32>
    %83 = vector.broadcast %82 : vector<1x8xf32> to vector<64x8xf32>
    %84 = arith.addf %81, %83 : vector<64x8xf32>
    %c0_95 = arith.constant 0 : index
    %c3_96 = arith.constant 3 : index
    %c0_97 = arith.constant 0 : index
    %c0_98 = arith.constant 0 : index
    %85 = vector.load %arg4[%c0_95, %c3_96, %c0_97, %c0_98] : memref<1x4x64x8xf32, #tpu.memory_space<vmem>>, vector<1x1x64x8xf32>
    %86 = vector.shape_cast %85 : vector<1x1x64x8xf32> to vector<64x8xf32>
    %87 = vector.shape_cast %84 : vector<64x8xf32> to vector<1x1x64x8xf32>
    tpu.vector_store %arg4[%c0_95, %c3_96, %c0_97, %c0_98], %87 {strides = array<i32>} : memref<1x4x64x8xf32, #tpu.memory_space<vmem>>, vector<1x1x64x8xf32>,
    return
  }
  func.func @transform_0(%arg0: i32) -> (i32, i32, i32, i32) {
    %c0_i32 = arith.constant 0 : i32
    %c0_i32_0 = arith.constant 0 : i32
    %c0_i32_1 = arith.constant 0 : i32
    %c0_i32_2 = arith.constant 0 : i32
    return %arg0, %c0_i32, %c0_i32_0, %c0_i32_1 : i32, i32, i32, i32
  }
  func.func @transform_1(%arg0: i32) -> (i32, i32, i32) {
    %c0_i32 = arith.constant 0 : i32
    %c0_i32_0 = arith.constant 0 : i32
    %c0_i32_1 = arith.constant 0 : i32
    %c0_i32_2 = arith.constant 0 : i32
    return %c0_i32, %c0_i32_0, %c0_i32_1 : i32, i32, i32
  }
  func.func @transform_2(%arg0: i32) -> (i32, i32) {
    %c0_i32 = arith.constant 0 : i32
    %c0_i32_0 = arith.constant 0 : i32
    %c0_i32_1 = arith.constant 0 : i32
    return %c0_i32, %c0_i32_0 : i32, i32
  }
  func.func @transform_3(%arg0: i32) -> (i32, i32, i32, i32) {
    %c0_i32 = arith.constant 0 : i32
    %c0_i32_0 = arith.constant 0 : i32
    %c0_i32_1 = arith.constant 0 : i32
    %c0_i32_2 = arith.constant 0 : i32
    return %arg0, %c0_i32, %c0_i32_0, %c0_i32_1 : i32, i32, i32, i32
  }
}

</mosaic_0001>

<bundles_post_ra>
// kernel: tpu_custom_call.1
= control target key start
LH: loop header
LB: loop body
LE: loop exit
PB: predicated region body
PF: predicated region fallthrough
CT: control target
= control target key end

     0   :  { %s1788_s12 = smov 0   ;;  %s2388_s0 = inlined_call_operand.vmem [shape: f32[2,10,10,8], index: 0, kind: input, shape index: {}]   ;;  %s2389_s1 = inlined_call_operand.vmem [shape: f32[4,32,8], index: 1, kind: input, shape index: {}]   ;;  %s2390_s2 = inlined_call_operand.vmem [shape: f32[1,8], index: 2, kind: input, shape index: {}]   ;;  %s2391_s3 = inlined_call_operand.vmem [shape: f32[2,4,64,8], index: 3, kind: output, shape index: {}]  }
   0x1 LB: > { %s1438_s13 = sadd.s32 4294967295, %s1763_s12   ;;  %p1442_p0 = scmp.ge.s32.totalorder %s1763_s12, 1  ;;  %s1763_s12 = sphi %s1788_s12, %s13_s12  }
   0x2   : > { %p137_p1 = scmp.lt.s32.totalorder %s1763_s12, 3 }
   0x4   : > { %p138_p2 = pnand %p1442_p0, %p137_p1 }
   0x5   : > { %p161_p3 = scmp.lt.s32.totalorder (!%p138_p2), %s1438_s13, 1  ;;  %s1765_s18 = smov (!%p138_p2), 8  }
   0x6   : > { %141 = sbr.rel (%p138_p2) target bundleno = 518 (0x206), region = 32  ;;  %s1766_s19 = smov (!%p138_p2), 16  }
   0x7   : > { %s1767_s30 = smov (!%p138_p2), 24  }
   0xb   : > { %s2393_s13 = smov (!%p161_p3, %s1438_s13), 1  ;;  %v330_v6 = vld [vmem:[%s2389_s1 + $0x18] sm:$0xff]  ;;  %v329_v9 = vld [vmem:[%s2389_s1 + $0x10] sm:$0xff]  ;;  %v328_v11 = vld [vmem:[%s2389_s1 + $0x8] sm:$0xff]  ;;  %vm300_vm0 = vcmask 64512   ;;  %vm309_vm1 = vcmask 130048  }
   0xc   : > { %s1745_s14 = smul.u32 160, %s2393_s13  ;;  %1665 = vmatprep.subr.mxu0 %v330_v6  ;;  %v1490_v8 = vld [vmem:[%s2389_s1 + $0x38] sm:$0xff]  ;;  %v1489_v10 = vld [vmem:[%s2389_s1 + $0x30] sm:$0xff]  ;;  %v1488_v12 = vld [vmem:[%s2389_s1 + $0x28] sm:$0xff]  ;;  %vm318_vm2 = vcmask 195584   ;;  %vm338_vm3 = vcmask 261120  }
   0xd   : > { %1685 = vmatprep.subr.mxu1 %v1490_v8  ;;  %1666 = vmatpush3.msra.mxu0 %v330_v6  ;;  %v327_v14 = vld [vmem:[%s2389_s1] sm:$0xff]  ;;  %v1543_v34 = vld [vmem:[%s2389_s1 + $0x58] sm:$0xff]  ;;  %v1595_v60 = vld [vmem:[%s2389_s1 + $0x70] sm:$0xff] }
   0xe   : > { %s1802_s17 = scalar_lea.vmem %s2388_s0, %s1745_s14  ;;  %1686 = vmatpush3.msra.mxu1 %v1490_v8  ;;  %1667 = vmatprep.subr.mxu0 %v329_v9  ;;  %v1487_v15 = vld [vmem:[%s2389_s1 + $0x20] sm:$0xff]  ;;  %v1596_v35 = vld [vmem:[%s2389_s1 + $0x78] sm:$0xff]  ;;  %v1542_v61 = vld [vmem:[%s2389_s1 + $0x50] sm:$0xff] }
   0xf   : > { %v1805_v0 = vld [vmem:[%s1802_s17 + $0x20] sm:$0xff]  ;;  %v1808_v1 = vld [vmem:[%s1802_s17 + $0x10] sm:$0xff]  ;;  %1687 = vmatprep.subr.mxu1 %v1489_v10  ;;  %1668 = vmatpush3.msra.mxu0 %v329_v9 }
  0x10   : > { %214 = vrot.lane.b32.xlu1 %v1805_v0, %s1765_s18  ;;  %212 = vrot.lane.b32.xlu0 %v1808_v1, %s1765_s18  ;;  %v188_v2 = vld [vmem:[%s1802_s17 + $0x1] sm:$0xff]  ;;  %v1816_v3 = vld [vmem:[%s1802_s17 + $0x11] sm:$0xff] }
  0x11   : > { %v492_v4 = vld [vmem:[%s1802_s17 + $0x2] sm:$0xff]  ;;  %v1851_v13 = vld [vmem:[%s1802_s17 + $0x12] sm:$0xff]  ;;  %1688 = vmatpush3.msra.mxu1 %v1489_v10  ;;  %1669 = vmatprep.subr.mxu0 %v328_v11 }
  0x12   : > { %v1823_v5 = vld [vmem:[%s1802_s17 + $0x21] sm:$0xff]  ;;  %1689 = vmatprep.subr.mxu1 %v1488_v12  ;;  %1670 = vmatpush3.msra.mxu0 %v328_v11  ;;  %v1867_v16 = vld [vmem:[%s1802_s17 + $0x31] sm:$0xff] }
  0x13   : > { %v196_v7 = vld [vmem:[%s1802_s17] sm:$0xff]  ;;  %1690 = vmatpush3.msra.mxu1 %v1488_v12  ;;  %1671 = vmatprep.subr.mxu0 %v327_v14  ;;  %v1870_v17 = vld [vmem:[%s1802_s17 + $0x30] sm:$0xff] }
  0x14   : > { %244 = vrot.lane.b32.xlu1 %v188_v2, %s1766_s19  ;;  %516 = vrot.lane.b32.xlu0 %v1816_v3, %s1765_s18  ;;  %v1877_v18 = vld [vmem:[%s1802_s17 + $0x40] sm:$0xff]  ;;  %v1898_v21 = vld [vmem:[%s1802_s17 + $0x32] sm:$0xff] }
  0x15   : > { %1691 = vmatprep.subr.mxu1 %v1487_v15  ;;  %1672 = vmatpush3.msra.mxu0 %v327_v14  ;;  %v1884_v19 = vld [vmem:[%s1802_s17 + $0x22] sm:$0xff]  ;;  %v1909_v22 = vld [vmem:[%s1802_s17 + $0x51] sm:$0xff] }
  0x16   : > { %1692 = vmatpush3.msra.mxu1 %v1487_v15  ;;  %v1887_v20 = vld [vmem:[%s1802_s17 + $0x41] sm:$0xff]  ;;  %v1912_v23 = vld [vmem:[%s1802_s17 + $0x50] sm:$0xff]  ;;  %1705 = vmatprep.subr.mxu0 %v1543_v34 }
  0x17   : > { %v1919_v24 = vld [vmem:[%s1802_s17 + $0x60] sm:$0xff]  ;;  %v1940_v27 = vld [vmem:[%s1802_s17 + $0x52] sm:$0xff]  ;;  %1725 = vmatprep.subr.mxu1 %v1596_v35 }
  0x18   : > { %548 = vrot.lane.b32.xlu1 %v492_v4, %s1766_s19  ;;  %518 = vrot.lane.b32.xlu0 %v1823_v5, %s1765_s18  ;;  %v1926_v25 = vld [vmem:[%s1802_s17 + $0x42] sm:$0xff]  ;;  %v1951_v28 = vld [vmem:[%s1802_s17 + $0x71] sm:$0xff] }
  0x19   : > { %v1929_v26 = vld [vmem:[%s1802_s17 + $0x61] sm:$0xff]  ;;  %v1954_v29 = vld [vmem:[%s1802_s17 + $0x70] sm:$0xff] }
  0x1a   : > { %v1961_v30 = vld [vmem:[%s1802_s17 + $0x80] sm:$0xff]  ;;  %v1982_v33 = vld [vmem:[%s1802_s17 + $0x72] sm:$0xff] }
  0x1b   : > { %v1968_v31 = vld [vmem:[%s1802_s17 + $0x62] sm:$0xff] }
  0x1c   : > { %276 = vrot.lane.b32.xlu1 %v196_v7, %s1767_s30  ;;  %246 = vrot.lane.b32.xlu0 %v1816_v3, %s1766_s19  ;;  %v1971_v32 = vld [vmem:[%s1802_s17 + $0x81] sm:$0xff] }
  0x1d   : > { %v1593_v4 = vld [vmem:[%s2389_s1 + $0x60] sm:$0xff] }
  0x1e   : > { %v1540_v6 = vld [vmem:[%s2389_s1 + $0x40] sm:$0xff] }
  0x20   : > { %580 = vrot.lane.b32.xlu1 %v188_v2, %s1767_s30  ;;  %550 = vrot.lane.b32.xlu0 %v1851_v13, %s1766_s19 }
  0x24   : > { %582 = vrot.lane.b32.xlu1 %v1816_v3, %s1767_s30  ;;  %278 = vrot.lane.b32.xlu0 %v1808_v1, %s1767_s30 }
  0x28   : > { %520 = vrot.lane.b32.xlu1 %v1867_v16, %s1765_s18  ;;  %216 = vrot.lane.b32.xlu0 %v1870_v17, %s1765_s18 }
  0x2c   : > { %248 = vrot.lane.b32.xlu1 %v1823_v5, %s1766_s19  ;;  %218 = vrot.lane.b32.xlu0 %v1877_v18, %s1765_s18 }
  0x30   : > { %552 = vrot.lane.b32.xlu1 %v1884_v19, %s1766_s19  ;;  %522 = vrot.lane.b32.xlu0 %v1887_v20, %s1765_s18 }
  0x34   : > { %280 = vrot.lane.b32.xlu1 %v1805_v0, %s1767_s30  ;;  %250 = vrot.lane.b32.xlu0 %v1867_v16, %s1766_s19 }
  0x38   : > { %584 = vrot.lane.b32.xlu1 %v1823_v5, %s1767_s30  ;;  %554 = vrot.lane.b32.xlu0 %v1898_v21, %s1766_s19 }
  0x3c   : > { %586 = vrot.lane.b32.xlu1 %v1867_v16, %s1767_s30  ;;  %282 = vrot.lane.b32.xlu0 %v1870_v17, %s1767_s30 }
  0x40   : > { %524 = vrot.lane.b32.xlu1 %v1909_v22, %s1765_s18  ;;  %220 = vrot.lane.b32.xlu0 %v1912_v23, %s1765_s18 }
  0x44   : > { %252 = vrot.lane.b32.xlu1 %v1887_v20, %s1766_s19  ;;  %222 = vrot.lane.b32.xlu0 %v1919_v24, %s1765_s18 }
  0x48   : > { %556 = vrot.lane.b32.xlu1 %v1926_v25, %s1766_s19  ;;  %526 = vrot.lane.b32.xlu0 %v1929_v26, %s1765_s18 }
  0x4c   : > { %284 = vrot.lane.b32.xlu1 %v1877_v18, %s1767_s30  ;;  %254 = vrot.lane.b32.xlu0 %v1909_v22, %s1766_s19 }
  0x50   : > { %588 = vrot.lane.b32.xlu1 %v1887_v20, %s1767_s30  ;;  %558 = vrot.lane.b32.xlu0 %v1940_v27, %s1766_s19 }
  0x54   : > { %590 = vrot.lane.b32.xlu1 %v1909_v22, %s1767_s30  ;;  %286 = vrot.lane.b32.xlu0 %v1912_v23, %s1767_s30 }
  0x58   : > { %528 = vrot.lane.b32.xlu1 %v1951_v28, %s1765_s18  ;;  %224 = vrot.lane.b32.xlu0 %v1954_v29, %s1765_s18 }
  0x5c   : > { %256 = vrot.lane.b32.xlu1 %v1929_v26, %s1766_s19  ;;  %226 = vrot.lane.b32.xlu0 %v1961_v30, %s1765_s18 }
  0x60   : > { %560 = vrot.lane.b32.xlu1 %v1968_v31, %s1766_s19  ;;  %530 = vrot.lane.b32.xlu0 %v1971_v32, %s1765_s18 }
  0x64   : > { %288 = vrot.lane.b32.xlu1 %v1919_v24, %s1767_s30  ;;  %258 = vrot.lane.b32.xlu0 %v1951_v28, %s1766_s19 }
  0x68   : > { %592 = vrot.lane.b32.xlu1 %v1929_v26, %s1767_s30  ;;  %562 = vrot.lane.b32.xlu0 %v1982_v33, %s1766_s19 }
  0x6c   : > { %594 = vrot.lane.b32.xlu1 %v1951_v28, %s1767_s30  ;;  %290 = vrot.lane.b32.xlu0 %v1954_v29, %s1767_s30 }
  0x70   : > { %1121 = vrot.lane.b32.xlu1 %v1823_v5, %s1765_s18  ;;  %819 = vrot.lane.b32.xlu0 %v1805_v0, %s1765_s18 }
  0x74   : > { %851 = vrot.lane.b32.xlu1 %v1816_v3, %s1766_s19  ;;  %821 = vrot.lane.b32.xlu0 %v1870_v17, %s1765_s18 }
  0x78   : > { %1153 = vrot.lane.b32.xlu1 %v1851_v13, %s1766_s19  ;;  %1123 = vrot.lane.b32.xlu0 %v1867_v16, %s1765_s18 }
  0x7c   : > { %883 = vrot.lane.b32.xlu1 %v1808_v1, %s1767_s30  ;;  %853 = vrot.lane.b32.xlu0 %v1823_v5, %s1766_s19  ;;  %v1594_v1 = vld [vmem:[%s2389_s1 + $0x68] sm:$0xff] }
  0x80   : > { %1185 = vrot.lane.b32.xlu1 %v1816_v3, %s1767_s30  ;;  %1155 = vrot.lane.b32.xlu0 %v1884_v19, %s1766_s19 }
  0x82   : > { %v215_v36 = vpop.permute.xlu1 %214  ;;  %v213_v37 = vpop.permute.xlu0 %212 }
  0x83   : > { %v301_v42 = vsel %vm300_vm0, %v1816_v3, %v213_v37  ;;  %v302_v52 = vsel %vm300_vm0, %v1823_v5, %v215_v36 }
  0x84   : > { %1187 = vrot.lane.b32.xlu1 %v1823_v5, %s1767_s30  ;;  %885 = vrot.lane.b32.xlu0 %v1805_v0, %s1767_s30  ;;  %v1541_v0 = vld [vmem:[%s2389_s1 + $0x48] sm:$0xff] }
  0x86   : > { %v245_v38 = vpop.permute.xlu1 %244  ;;  %v517_v39 = vpop.permute.xlu0 %516 }
  0x87   : > { %v310_v43 = vsel %vm309_vm1, %v301_v42, %v245_v38  ;;  %v604_v47 = vsel %vm300_vm0, %v1851_v13, %v517_v39 }
  0x88   : > { %1125 = vrot.lane.b32.xlu1 %v1887_v20, %s1765_s18  ;;  %823 = vrot.lane.b32.xlu0 %v1877_v18, %s1765_s18 }
  0x8a   : > { %v549_v40 = vpop.permute.xlu1 %548  ;;  %v519_v41 = vpop.permute.xlu0 %518 }
  0x8b   : > { %v612_v48 = vsel %vm309_vm1, %v604_v47, %v549_v40  ;;  %v605_v53 = vsel %vm300_vm0, %v1884_v19, %v519_v41 }
  0x8c   : > { %855 = vrot.lane.b32.xlu1 %v1867_v16, %s1766_s19  ;;  %825 = vrot.lane.b32.xlu0 %v1912_v23, %s1765_s18 }
  0x8e   : > { %v277_v44 = vpop.permute.xlu1 %276  ;;  %v247_v45 = vpop.permute.xlu0 %246 }
  0x8f   : > { %v319_v46 = vsel %vm318_vm2, %v310_v43, %v277_v44  ;;  %v311_v54 = vsel %vm309_vm1, %v302_v52, %v247_v45 }
  0x90   : > { %1157 = vrot.lane.b32.xlu1 %v1898_v21, %s1766_s19  ;;  %1127 = vrot.lane.b32.xlu0 %v1909_v22, %s1765_s18 }
  0x91   : > { %1673 = vmatprep.mubr.msk.f32.mxu0 %vm338_vm3, %v319_v46  ;;  %v1523_v46 = vld [vmem:[%s1802_s17 + $0x90] sm:$0xff] }
  0x92   : > { %v581_v49 = vpop.permute.xlu1 %580  ;;  %v551_v50 = vpop.permute.xlu0 %550 }
  0x93   : > { %v620_v51 = vsel %vm318_vm2, %v612_v48, %v581_v49  ;;  %v613_v55 = vsel %vm309_vm1, %v605_v53, %v551_v50 }
  0x94   : > { %887 = vrot.lane.b32.xlu1 %v1870_v17, %s1767_s30  ;;  %857 = vrot.lane.b32.xlu0 %v1887_v20, %s1766_s19 }
  0x95   : > { %1693 = vmatprep.mubr.msk.f32.mxu1 %vm338_vm3, %v620_v51 }
  0x96   : > { %v583_v56 = vpop.permute.xlu1 %582  ;;  %v279_v57 = vpop.permute.xlu0 %278 }
  0x97   : > { %v621_v58 = vsel %vm318_vm2, %v613_v55, %v583_v56  ;;  %v320_v59 = vsel %vm318_vm2, %v311_v54, %v279_v57 }
  0x98   : > { %1189 = vrot.lane.b32.xlu1 %v1867_v16, %s1767_s30  ;;  %1159 = vrot.lane.b32.xlu0 %v1926_v25, %s1766_s19 }
  0x99   : > { %1674 = vmatmul.mubr.msk.f32.vlgmr.msra.gmra.mxu0 %vm338_vm3, %v320_v59  ;;  %1694 = vmatmul.mubr.msk.f32.vlgmr.msra.gmra.mxu1 %vm338_vm3, %v621_v58 }
  0x9a   : > { %v521_v62 = vpop.permute.xlu1 %520  ;;  %v217_v63 = vpop.permute.xlu0 %216  ;;  %1706 = vmatpush3.msra.mxu0 %v1543_v34  ;;  %1726 = vmatpush3.msra.mxu1 %v1596_v35 }
  0x9b   : > { %1727 = vmatprep.subr.mxu1 %v1595_v60  ;;  %1707 = vmatprep.subr.mxu0 %v1542_v61  ;;  %v303_v9 = vsel %vm300_vm0, %v1867_v16, %v217_v63  ;;  %v606_v14 = vsel %vm300_vm0, %v1898_v21, %v521_v62 }
  0x9c   : > { %1191 = vrot.lane.b32.xlu1 %v1887_v20, %s1767_s30  ;;  %889 = vrot.lane.b32.xlu0 %v1877_v18, %s1767_s30 }
  0x9d   : > { %1708 = vmatpush3.msra.mxu0 %v1542_v61  ;;  %1728 = vmatpush3.msra.mxu1 %v1595_v60  ;;  %v2162_v61 = vld [vmem:[%s1802_s17 + $0x82] sm:$0xff] }
  0x9e   : > { %v249_v2 = vpop.permute.xlu1 %248  ;;  %v219_v3 = vpop.permute.xlu0 %218  ;;  %1709 = vmatprep.subr.mxu0 %v1541_v0  ;;  %1729 = vmatprep.subr.mxu1 %v1594_v1 }
  0x9f   : > { %1710 = vmatpush3.msra.mxu0 %v1541_v0  ;;  %1730 = vmatpush3.msra.mxu1 %v1594_v1  ;;  %v312_v10 = vsel %vm309_vm1, %v303_v9, %v249_v2  ;;  %v304_v35 = vsel %vm300_vm0, %v1887_v20, %v219_v3 }
  0xa0   : > { %1129 = vrot.lane.b32.xlu1 %v1929_v26, %s1765_s18  ;;  %827 = vrot.lane.b32.xlu0 %v1919_v24, %s1765_s18 }
  0xa1   : > { %1731 = vmatprep.subr.mxu1 %v1593_v4  ;;  %1711 = vmatprep.subr.mxu0 %v1540_v6 }
  0xa2   : > { %v553_v7 = vpop.permute.xlu1 %552  ;;  %v523_v8 = vpop.permute.xlu0 %522  ;;  %1712 = vmatpush3.msra.mxu0 %v1540_v6  ;;  %1732 = vmatpush3.msra.mxu1 %v1593_v4 }
  0xa3   : > { %v614_v15 = vsel %vm309_vm1, %v606_v14, %v553_v7  ;;  %v607_v36 = vsel %vm300_vm0, %v1926_v25, %v523_v8 }
  0xa4   : > { %859 = vrot.lane.b32.xlu1 %v1909_v22, %s1766_s19  ;;  %829 = vrot.lane.b32.xlu0 %v1954_v29, %s1765_s18 }
  0xa6   : > { %v281_v11 = vpop.permute.xlu1 %280  ;;  %v251_v12 = vpop.permute.xlu0 %250 }
  0xa7   : > { %v321_v13 = vsel %vm318_vm2, %v312_v10, %v281_v11  ;;  %v313_v37 = vsel %vm309_vm1, %v304_v35, %v251_v12 }
  0xa8   : > { %1161 = vrot.lane.b32.xlu1 %v1940_v27, %s1766_s19  ;;  %1131 = vrot.lane.b32.xlu0 %v1951_v28, %s1765_s18 }
  0xa9   : > { %1676 = vmatprep.mubr.msk.f32.mxu0 %vm338_vm3, %v321_v13 }
  0xaa   : > { %v585_v17 = vpop.permute.xlu1 %584  ;;  %v555_v18 = vpop.permute.xlu0 %554 }
  0xab   : > { %v622_v34 = vsel %vm318_vm2, %v614_v15, %v585_v17  ;;  %v615_v38 = vsel %vm309_vm1, %v607_v36, %v555_v18 }
  0xac   : > { %891 = vrot.lane.b32.xlu1 %v1912_v23, %s1767_s30  ;;  %861 = vrot.lane.b32.xlu0 %v1929_v26, %s1766_s19 }
  0xad   : > { %1696 = vmatprep.mubr.msk.f32.mxu1 %vm338_vm3, %v622_v34 }
  0xae   : > { %v587_v39 = vpop.permute.xlu1 %586  ;;  %v283_v40 = vpop.permute.xlu0 %282 }
  0xaf   : > { %v623_v23 = vsel %vm318_vm2, %v615_v38, %v587_v39  ;;  %v322_v41 = vsel %vm318_vm2, %v313_v37, %v283_v40 }
  0xb0   : > { %1193 = vrot.lane.b32.xlu1 %v1909_v22, %s1767_s30  ;;  %1163 = vrot.lane.b32.xlu0 %v1968_v31, %s1766_s19 }
  0xb1   : > { %1677 = vmatmul.mubr.msk.f32.gmra.mxu0 %vm338_vm3, %v322_v41  ;;  %1697 = vmatmul.mubr.msk.f32.gmra.mxu1 %vm338_vm3, %v623_v23 }
  0xb2   : > { %v525_v42 = vpop.permute.xlu1 %524  ;;  %v221_v43 = vpop.permute.xlu0 %220 }
  0xb3   : > { %v305_v49 = vsel %vm300_vm0, %v1909_v22, %v221_v43  ;;  %v608_v54 = vsel %vm300_vm0, %v1940_v27, %v525_v42 }
  0xb4   : > { %1195 = vrot.lane.b32.xlu1 %v1929_v26, %s1767_s30  ;;  %893 = vrot.lane.b32.xlu0 %v1919_v24, %s1767_s30  ;;  %v2139_v24 = vld [vmem:[%s1802_s17 + $0x91] sm:$0xff] }
  0xb6   : > { %v253_v44 = vpop.permute.xlu1 %252  ;;  %v223_v45 = vpop.permute.xlu0 %222 }
  0xb7   : > { %v314_v50 = vsel %vm309_vm1, %v305_v49, %v253_v44  ;;  %v306_v59 = vsel %vm300_vm0, %v1929_v26, %v223_v45 }
  0xb8   : > { %1133 = vrot.lane.b32.xlu1 %v1971_v32, %s1765_s18  ;;  %831 = vrot.lane.b32.xlu0 %v1961_v30, %s1765_s18 }
  0xba   : > { %v557_v47 = vpop.permute.xlu1 %556  ;;  %v527_v48 = vpop.permute.xlu0 %526 }
  0xbb   : > { %v616_v55 = vsel %vm309_vm1, %v608_v54, %v557_v47  ;;  %v609_v60 = vsel %vm300_vm0, %v1968_v31, %v527_v48 }
  0xbc   : > { %863 = vrot.lane.b32.xlu1 %v1951_v28, %s1766_s19  ;;  %833 = vrot.lane.b32.xlu0 %v1523_v46, %s1765_s18 }
  0xbe   : > { %v285_v51 = vpop.permute.xlu1 %284  ;;  %v255_v52 = vpop.permute.xlu0 %254 }
  0xbf   : > { %v323_v53 = vsel %vm318_vm2, %v314_v50, %v285_v51  ;;  %v315_v62 = vsel %vm309_vm1, %v306_v59, %v255_v52 }
  0xc0   : > { %1165 = vrot.lane.b32.xlu1 %v1982_v33, %s1766_s19  ;;  %1135 = vrot.lane.b32.xlu0 %v2139_v24, %s1765_s18 }
  0xc1   : > { %1679 = vmatprep.mubr.msk.f32.mxu0 %vm338_vm3, %v323_v53 }
  0xc2   : > { %v589_v56 = vpop.permute.xlu1 %588  ;;  %v559_v57 = vpop.permute.xlu0 %558 }
  0xc3   : > { %v624_v58 = vsel %vm318_vm2, %v616_v55, %v589_v56  ;;  %v617_v63 = vsel %vm309_vm1, %v609_v60, %v559_v57 }
  0xc4   : > { %895 = vrot.lane.b32.xlu1 %v1954_v29, %s1767_s30  ;;  %865 = vrot.lane.b32.xlu0 %v1971_v32, %s1766_s19 }
  0xc5   : > { %1699 = vmatprep.mubr.msk.f32.mxu1 %vm338_vm3, %v624_v58 }
  0xc6   : > { %v591_v0 = vpop.permute.xlu1 %590  ;;  %v287_v1 = vpop.permute.xlu0 %286 }
  0xc7   : > { %v625_v29 = vsel %vm318_vm2, %v617_v63, %v591_v0  ;;  %v324_v2 = vsel %vm318_vm2, %v315_v62, %v287_v1 }
  0xc8   : > { %1197 = vrot.lane.b32.xlu1 %v1951_v28, %s1767_s30  ;;  %1167 = vrot.lane.b32.xlu0 %v2162_v61, %s1766_s19 }
  0xc9   : > { %1680 = vmatmul.mubr.msk.f32.gmra.mxu0 %vm338_vm3, %v324_v2  ;;  %1700 = vmatmul.mubr.msk.f32.gmra.mxu1 %vm338_vm3, %v625_v29 }
  0xca   : > { %v529_v3 = vpop.permute.xlu1 %528  ;;  %v225_v4 = vpop.permute.xlu0 %224 }
  0xcb   : > { %v307_v10 = vsel %vm300_vm0, %v1951_v28, %v225_v4  ;;  %v610_v15 = vsel %vm300_vm0, %v1982_v33, %v529_v3 }
  0xcc   : > { %1199 = vrot.lane.b32.xlu1 %v1971_v32, %s1767_s30  ;;  %897 = vrot.lane.b32.xlu0 %v1961_v30, %s1767_s30 }
  0xce   : > { %v257_v6 = vpop.permute.xlu1 %256  ;;  %v227_v7 = vpop.permute.xlu0 %226 }
  0xcf   : > { %v316_v11 = vsel %vm309_vm1, %v307_v10, %v257_v6  ;;  %v308_v35 = vsel %vm300_vm0, %v1971_v32, %v227_v7 }
  0xd2   : > { %v561_v8 = vpop.permute.xlu1 %560  ;;  %v531_v9 = vpop.permute.xlu0 %530 }
  0xd3   : > { %v618_v30 = vsel %vm309_vm1, %v610_v15, %v561_v8  ;;  %v611_v36 = vsel %vm300_vm0, %v2162_v61, %v531_v9 }
  0xd6   : > { %v289_v12 = vpop.permute.xlu1 %288  ;;  %v259_v13 = vpop.permute.xlu0 %258 }
  0xd7   : > { %v325_v14 = vsel %vm318_vm2, %v316_v11, %v289_v12  ;;  %v317_v37 = vsel %vm309_vm1, %v308_v35, %v259_v13 }
  0xd8   : > { %1682 = vmatprep.mubr.msk.f32.mxu0 %vm338_vm3, %v325_v14 }
  0xda   : > { %v593_v17 = vpop.permute.xlu1 %592  ;;  %v563_v18 = vpop.permute.xlu0 %562 }
  0xdb   : > { %v626_v34 = vsel %vm318_vm2, %v618_v30, %v593_v17  ;;  %v619_v38 = vsel %vm309_vm1, %v611_v36, %v563_v18 }
  0xdc   : > { %1702 = vmatprep.mubr.msk.f32.mxu1 %vm338_vm3, %v626_v34 }
  0xde   : > { %v595_v39 = vpop.permute.xlu1 %594  ;;  %v291_v40 = vpop.permute.xlu0 %290 }
  0xdf   : > { %v627_v23 = vsel %vm318_vm2, %v619_v38, %v595_v39  ;;  %v326_v41 = vsel %vm318_vm2, %v317_v37, %v291_v40 }
  0xe0   : > { %1683 = vmatmul.mubr.msk.f32.gmra.mxu0 %vm338_vm3, %v326_v41  ;;  %1703 = vmatmul.mubr.msk.f32.gmra.mxu1 %vm338_vm3, %v627_v23 }
  0xe2   : > { %v1122_v42 = vpop.permute.xlu1 %1121  ;;  %v820_v43 = vpop.permute.xlu0 %819 }
  0xe3   : > { %v907_v48 = vsel %vm300_vm0, %v1823_v5, %v820_v43  ;;  %v1209_v53 = vsel %vm300_vm0, %v1884_v19, %v1122_v42 }
  0xe6   : > { %v852_v44 = vpop.permute.xlu1 %851  ;;  %v822_v45 = vpop.permute.xlu0 %821 }
  0xe7   : > { %v915_v49 = vsel %vm309_vm1, %v907_v48, %v852_v44  ;;  %v908_v5 = vsel %vm300_vm0, %v1867_v16, %v822_v45 }
  0xea   : > { %v1154_v46 = vpop.permute.xlu1 %1153  ;;  %v1124_v47 = vpop.permute.xlu0 %1123 }
  0xeb   : > { %v1217_v54 = vsel %vm309_vm1, %v1209_v53, %v1154_v46  ;;  %v1210_v58 = vsel %vm300_vm0, %v1898_v21, %v1124_v47 }
  0xee   : > { %v884_v50 = vpop.permute.xlu1 %883  ;;  %v854_v51 = vpop.permute.xlu0 %853 }
  0xef   : > { %v923_v52 = vsel %vm318_vm2, %v915_v49, %v884_v50  ;;  %v916_v59 = vsel %vm309_vm1, %v908_v5, %v854_v51 }
  0xf0   : > { %1713 = vmatprep.mubr.msk.f32.mxu0 %vm338_vm3, %v923_v52 }
  0xf2   : > { %v1186_v55 = vpop.permute.xlu1 %1185  ;;  %v1156_v56 = vpop.permute.xlu0 %1155 }
  0xf3   : > { %v1225_v57 = vsel %vm318_vm2, %v1217_v54, %v1186_v55  ;;  %v1218_v60 = vsel %vm309_vm1, %v1210_v58, %v1156_v56 }
  0xf4   : > { %1733 = vmatprep.mubr.msk.f32.mxu1 %vm338_vm3, %v1225_v57 }
  0xf6   : > { %v1188_v62 = vpop.permute.xlu1 %1187  ;;  %v886_v19 = vpop.permute.xlu0 %885 }
  0xf7   : > { %v1226_v63 = vsel %vm318_vm2, %v1218_v60, %v1188_v62  ;;  %v924_v0 = vsel %vm318_vm2, %v916_v59, %v886_v19 }
  0xf8   : > { %1714 = vmatmul.mubr.msk.f32.vlgmr.msra.gmra.mxu0 %vm338_vm3, %v924_v0  ;;  %1734 = vmatmul.mubr.msk.f32.vlgmr.msra.gmra.mxu1 %vm338_vm3, %v1226_v63 }
  0xfa   : > { %v1126_v1 = vpop.permute.xlu1 %1125  ;;  %v824_v29 = vpop.permute.xlu0 %823 }
  0xfb   : > { %v909_v4 = vsel %vm300_vm0, %v1887_v20, %v824_v29  ;;  %v1211_v10 = vsel %vm300_vm0, %v1926_v25, %v1126_v1  ;;  %v1568_v1 = vld [vmem:[%s1802_s17 + $0x92] sm:$0xff]  ;;  %s1616_s17 = sshll.u32 %s2393_s13, 8 }
  0xfc   : > { %s2287_s6 = scalar_lea.vmem %s2391_s3, %s1616_s17 }
  0xfe   : > { %v856_v16 = vpop.permute.xlu1 %855  ;;  %v826_v2 = vpop.permute.xlu0 %825 }
  0xff   : > { %v917_v6 = vsel %vm309_vm1, %v909_v4, %v856_v16  ;;  %v910_v20 = vsel %vm300_vm0, %v1909_v22, %v826_v2 }
 0x102   : > { %v1158_v3 = vpop.permute.xlu1 %1157  ;;  %v1128_v21 = vpop.permute.xlu0 %1127 }
 0x103   : > { %v1219_v11 = vsel %vm309_vm1, %v1211_v10, %v1158_v3  ;;  %v1212_v15 = vsel %vm300_vm0, %v1940_v27, %v1128_v21 }
 0x106   : > { %v888_v7 = vpop.permute.xlu1 %887  ;;  %v858_v8 = vpop.permute.xlu0 %857 }
 0x107   : > { %v925_v9 = vsel %vm318_vm2, %v917_v6, %v888_v7  ;;  %v918_v30 = vsel %vm309_vm1, %v910_v20, %v858_v8 }
 0x108   : > { %1716 = vmatprep.mubr.msk.f32.mxu0 %vm338_vm3, %v925_v9 }
 0x10a   : > { %v1190_v12 = vpop.permute.xlu1 %1189  ;;  %v1160_v13 = vpop.permute.xlu0 %1159 }
 0x10b   : > { %v1227_v14 = vsel %vm318_vm2, %v1219_v11, %v1190_v12  ;;  %v1220_v17 = vsel %vm309_vm1, %v1212_v15, %v1160_v13 }
 0x10c   : > { %1736 = vmatprep.mubr.msk.f32.mxu1 %vm338_vm3, %v1227_v14 }
 0x10e   : > { %v1192_v18 = vpop.permute.xlu1 %1191  ;;  %v890_v25 = vpop.permute.xlu0 %889 }
 0x10f   : > { %v1228_v34 = vsel %vm318_vm2, %v1220_v17, %v1192_v18  ;;  %v926_v35 = vsel %vm318_vm2, %v918_v30, %v890_v25 }
 0x110   : > { %1717 = vmatmul.mubr.msk.f32.gmra.mxu0 %vm338_vm3, %v926_v35  ;;  %1737 = vmatmul.mubr.msk.f32.gmra.mxu1 %vm338_vm3, %v1228_v34 }
 0x112   : > { %v1130_v36 = vpop.permute.xlu1 %1129  ;;  %v828_v37 = vpop.permute.xlu0 %827 }
 0x113   : > { %v911_v40 = vsel %vm300_vm0, %v1929_v26, %v828_v37  ;;  %v1213_v44 = vsel %vm300_vm0, %v1968_v31, %v1130_v36 }
 0x116   : > { %v860_v22 = vpop.permute.xlu1 %859  ;;  %v830_v38 = vpop.permute.xlu0 %829 }
 0x117   : > { %v919_v23 = vsel %vm309_vm1, %v911_v40, %v860_v22  ;;  %v912_v26 = vsel %vm300_vm0, %v1951_v28, %v830_v38 }
 0x11a   : > { %v1162_v39 = vpop.permute.xlu1 %1161  ;;  %v1132_v27 = vpop.permute.xlu0 %1131 }
 0x11b   : > { %v1221_v45 = vsel %vm309_vm1, %v1213_v44, %v1162_v39  ;;  %v1214_v49 = vsel %vm300_vm0, %v1982_v33, %v1132_v27 }
 0x11e   : > { %v892_v41 = vpop.permute.xlu1 %891  ;;  %v862_v42 = vpop.permute.xlu0 %861 }
 0x11f   : > { %v927_v43 = vsel %vm318_vm2, %v919_v23, %v892_v41  ;;  %v920_v50 = vsel %vm309_vm1, %v912_v26, %v862_v42 }
 0x120   : > { %1719 = vmatprep.mubr.msk.f32.mxu0 %vm338_vm3, %v927_v43 }
 0x122   : > { %v1194_v46 = vpop.permute.xlu1 %1193  ;;  %v1164_v47 = vpop.permute.xlu0 %1163 }
 0x123   : > { %v1229_v48 = vsel %vm318_vm2, %v1221_v45, %v1194_v46  ;;  %v1222_v51 = vsel %vm309_vm1, %v1214_v49, %v1164_v47 }
 0x124   : > { %1739 = vmatprep.mubr.msk.f32.mxu1 %vm338_vm3, %v1229_v48 }
 0x126   : > { %v1196_v52 = vpop.permute.xlu1 %1195  ;;  %v894_v31 = vpop.permute.xlu0 %893 }
 0x127   : > { %v1230_v53 = vsel %vm318_vm2, %v1222_v51, %v1196_v52  ;;  %v928_v54 = vsel %vm318_vm2, %v920_v50, %v894_v31 }
 0x128   : > { %1720 = vmatmul.mubr.msk.f32.gmra.mxu0 %vm338_vm3, %v928_v54  ;;  %1740 = vmatmul.mubr.msk.f32.gmra.mxu1 %vm338_vm3, %v1230_v53 }
 0x12a   : > { %v1134_v55 = vpop.permute.xlu1 %1133  ;;  %v832_v28 = vpop.permute.xlu0 %831 }
 0x12b   : > { %v913_v58 = vsel %vm300_vm0, %v1971_v32, %v832_v28  ;;  %v1215_v63 = vsel %vm300_vm0, %v2162_v61, %v1134_v55 }
 0x12e   : > { %v864_v56 = vpop.permute.xlu1 %863  ;;  %v834_v57 = vpop.permute.xlu0 %833 }
 0x12f   : > { %v921_v59 = vsel %vm309_vm1, %v913_v58, %v864_v56  ;;  %v914_v32 = vsel %vm300_vm0, %v2139_v24, %v834_v57  ;;  %v2282_v24 = vld [vmem:[%s2390_s2] ss:$0 sm:$0xff] }
 0x132   : > { %v1166_v33 = vpop.permute.xlu1 %1165  ;;  %v1136_v5 = vpop.permute.xlu0 %1135 }
 0x133   : > { %v1223_v0 = vsel %vm309_vm1, %v1215_v63, %v1166_v33  ;;  %v1216_v3 = vsel %vm300_vm0, %v1568_v1, %v1136_v5 }
 0x136   : > { %v896_v60 = vpop.permute.xlu1 %895  ;;  %v866_v62 = vpop.permute.xlu0 %865 }
 0x137   : > { %v929_v19 = vsel %vm318_vm2, %v921_v59, %v896_v60  ;;  %v922_v21 = vsel %vm309_vm1, %v914_v32, %v866_v62 }
 0x138   : > { %1722 = vmatprep.mubr.msk.f32.mxu0 %vm338_vm3, %v929_v19 }
 0x13a   : > { %v1198_v29 = vpop.permute.xlu1 %1197  ;;  %v1168_v16 = vpop.permute.xlu0 %1167 }
 0x13b   : > { %v1231_v2 = vsel %vm318_vm2, %v1223_v0, %v1198_v29  ;;  %v1224_v4 = vsel %vm309_vm1, %v1216_v3, %v1168_v16 }
 0x13c   : > { %1742 = vmatprep.mubr.msk.f32.mxu1 %vm338_vm3, %v1231_v2 }
 0x13e   : > { %v1200_v61 = vpop.permute.xlu1 %1199  ;;  %v898_v6 = vpop.permute.xlu0 %897 }
 0x13f   : > { %v1232_v7 = vsel %vm318_vm2, %v1224_v4, %v1200_v61  ;;  %v930_v8 = vsel %vm318_vm2, %v922_v21, %v898_v6 }
 0x140   : > { %1723 = vmatmul.mubr.msk.f32.gmra.mxu0 %vm338_vm3, %v930_v8  ;;  %1743 = vmatmul.mubr.msk.f32.gmra.mxu1 %vm338_vm3, %v1232_v7 }
 0x159   : > { %v1675_v9 = vpop.f32.mrf.mxu0  ;;  %v1695_v10 = vpop.f32.mrf.mxu1 }
 0x15a   : > { %v435_v11 = vadd.f32 %v1675_v9, %v2282_v24  ;;  %v736_v12 = vadd.f32 %v1695_v10, %v2282_v24 }
 0x15b   : > { %v429_v13 = vpop.f32.mrf.mxu0  ;;  %v730_v14 = vpop.f32.mrf.mxu1 }
 0x15c   : > { %469 = vst.msk [vmem:[%s2287_s6 + $0x8] sm:$0xff] %vm300_vm0, %v435_v11  ;;  %1501 = vst.msk [vmem:[%s2287_s6 + $0x48] sm:$0xff] %vm300_vm0, %v736_v12  ;;  %v430_v20 = vadd.f32 %v2282_v24, %v429_v13  ;;  %v731_v15 = vadd.f32 %v2282_v24, %v730_v14 }
 0x15e   : > { %468 = vst.msk [vmem:[%s2287_s6] sm:$0xff] %vm300_vm0, %v430_v20  ;;  %1500 = vst.msk [vmem:[%s2287_s6 + $0x40] sm:$0xff] %vm300_vm0, %v731_v15 }
 0x171   : > { %v1678_v30 = vpop.f32.mrf.mxu0  ;;  %v1698_v17 = vpop.f32.mrf.mxu1 }
 0x172   : > { %v445_v18 = vadd.f32 %v1678_v30, %v2282_v24  ;;  %v746_v25 = vadd.f32 %v1698_v17, %v2282_v24 }
 0x173   : > { %v439_v34 = vpop.f32.mrf.mxu0  ;;  %v740_v35 = vpop.f32.mrf.mxu1 }
 0x174   : > { %471 = vst.msk [vmem:[%s2287_s6 + $0x18] sm:$0xff] %vm300_vm0, %v445_v18  ;;  %1503 = vst.msk [vmem:[%s2287_s6 + $0x58] sm:$0xff] %vm300_vm0, %v746_v25  ;;  %v440_v36 = vadd.f32 %v2282_v24, %v439_v34  ;;  %v741_v37 = vadd.f32 %v2282_v24, %v740_v35 }
 0x176   : > { %470 = vst.msk [vmem:[%s2287_s6 + $0x10] sm:$0xff] %vm300_vm0, %v440_v36  ;;  %1502 = vst.msk [vmem:[%s2287_s6 + $0x50] sm:$0xff] %vm300_vm0, %v741_v37 }
 0x189   : > { %v1681_v22 = vpop.f32.mrf.mxu0  ;;  %v1701_v38 = vpop.f32.mrf.mxu1 }
 0x18a   : > { %v455_v39 = vadd.f32 %v1681_v22, %v2282_v24  ;;  %v756_v27 = vadd.f32 %v1701_v38, %v2282_v24 }
 0x18b   : > { %v449_v40 = vpop.f32.mrf.mxu0  ;;  %v750_v23 = vpop.f32.mrf.mxu1 }
 0x18c   : > { %473 = vst.msk [vmem:[%s2287_s6 + $0x28] sm:$0xff] %vm300_vm0, %v455_v39  ;;  %1505 = vst.msk [vmem:[%s2287_s6 + $0x68] sm:$0xff] %vm300_vm0, %v756_v27  ;;  %v450_v41 = vadd.f32 %v2282_v24, %v449_v40  ;;  %v751_v42 = vadd.f32 %v2282_v24, %v750_v23 }
 0x18e   : > { %472 = vst.msk [vmem:[%s2287_s6 + $0x20] sm:$0xff] %vm300_vm0, %v450_v41  ;;  %1504 = vst.msk [vmem:[%s2287_s6 + $0x60] sm:$0xff] %vm300_vm0, %v751_v42 }
 0x1a0   : > { %v1684_v43 = vpop.f32.mrf.mxu0  ;;  %v1704_v44 = vpop.f32.mrf.mxu1 }
 0x1a1   : > { %v465_v45 = vadd.f32 %v1684_v43, %v2282_v24  ;;  %v766_v46 = vadd.f32 %v1704_v44, %v2282_v24 }
 0x1a2   : > { %v459_v47 = vpop.f32.mrf.mxu0  ;;  %v760_v48 = vpop.f32.mrf.mxu1 }
 0x1a3   : > { %475 = vst.msk [vmem:[%s2287_s6 + $0x38] sm:$0xff] %vm300_vm0, %v465_v45  ;;  %1507 = vst.msk [vmem:[%s2287_s6 + $0x78] sm:$0xff] %vm300_vm0, %v766_v46  ;;  %v460_v26 = vadd.f32 %v2282_v24, %v459_v47  ;;  %v761_v49 = vadd.f32 %v2282_v24, %v760_v48 }
 0x1a5   : > { %474 = vst.msk [vmem:[%s2287_s6 + $0x30] sm:$0xff] %vm300_vm0, %v460_v26  ;;  %1506 = vst.msk [vmem:[%s2287_s6 + $0x70] sm:$0xff] %vm300_vm0, %v761_v49 }
 0x1b8   : > { %v1715_v50 = vpop.f32.mrf.mxu0  ;;  %v1735_v51 = vpop.f32.mrf.mxu1 }
 0x1b9   : > { %v1039_v52 = vadd.f32 %v1715_v50, %v2282_v24  ;;  %v1341_v31 = vadd.f32 %v1735_v51, %v2282_v24 }
 0x1ba   : > { %v1033_v53 = vpop.f32.mrf.mxu0  ;;  %v1335_v54 = vpop.f32.mrf.mxu1 }
 0x1bb   : > { %1554 = vst.msk [vmem:[%s2287_s6 + $0x88] sm:$0xff] %vm300_vm0, %v1039_v52  ;;  %1607 = vst.msk [vmem:[%s2287_s6 + $0xc8] sm:$0xff] %vm300_vm0, %v1341_v31  ;;  %v1034_v55 = vadd.f32 %v2282_v24, %v1033_v53  ;;  %v1336_v28 = vadd.f32 %v2282_v24, %v1335_v54 }
 0x1bd   : > { %1553 = vst.msk [vmem:[%s2287_s6 + $0x80] sm:$0xff] %vm300_vm0, %v1034_v55  ;;  %1606 = vst.msk [vmem:[%s2287_s6 + $0xc0] sm:$0xff] %vm300_vm0, %v1336_v28 }
 0x1d0   : > { %v1718_v56 = vpop.f32.mrf.mxu0  ;;  %v1738_v57 = vpop.f32.mrf.mxu1 }
 0x1d1   : > { %v1049_v33 = vadd.f32 %v1718_v56, %v2282_v24  ;;  %v1351_v5 = vadd.f32 %v1738_v57, %v2282_v24 }
 0x1d2   : > { %v1043_v58 = vpop.f32.mrf.mxu0  ;;  %v1345_v59 = vpop.f32.mrf.mxu1 }
 0x1d3   : > { %1556 = vst.msk [vmem:[%s2287_s6 + $0x98] sm:$0xff] %vm300_vm0, %v1049_v33  ;;  %1609 = vst.msk [vmem:[%s2287_s6 + $0xd8] sm:$0xff] %vm300_vm0, %v1351_v5  ;;  %v1044_v60 = vadd.f32 %v2282_v24, %v1043_v58  ;;  %v1346_v62 = vadd.f32 %v2282_v24, %v1345_v59 }
 0x1d5   : > { %1555 = vst.msk [vmem:[%s2287_s6 + $0x90] sm:$0xff] %vm300_vm0, %v1044_v60  ;;  %1608 = vst.msk [vmem:[%s2287_s6 + $0xd0] sm:$0xff] %vm300_vm0, %v1346_v62 }
 0x1e8   : > { %v1721_v19 = vpop.f32.mrf.mxu0  ;;  %v1741_v63 = vpop.f32.mrf.mxu1 }
 0x1e9   : > { %v1059_v0 = vadd.f32 %v1721_v19, %v2282_v24  ;;  %v1361_v1 = vadd.f32 %v1741_v63, %v2282_v24 }
 0x1ea   : > { %v1053_v29 = vpop.f32.mrf.mxu0  ;;  %v1355_v16 = vpop.f32.mrf.mxu1 }
 0x1eb   : > { %1558 = vst.msk [vmem:[%s2287_s6 + $0xa8] sm:$0xff] %vm300_vm0, %v1059_v0  ;;  %1611 = vst.msk [vmem:[%s2287_s6 + $0xe8] sm:$0xff] %vm300_vm0, %v1361_v1  ;;  %v1054_v2 = vadd.f32 %v2282_v24, %v1053_v29  ;;  %v1356_v32 = vadd.f32 %v2282_v24, %v1355_v16 }
 0x1ed   : > { %1557 = vst.msk [vmem:[%s2287_s6 + $0xa0] sm:$0xff] %vm300_vm0, %v1054_v2  ;;  %1610 = vst.msk [vmem:[%s2287_s6 + $0xe0] sm:$0xff] %vm300_vm0, %v1356_v32 }
 0x200   : > { %v1724_v3 = vpop.f32.mrf.mxu0  ;;  %v1744_v21 = vpop.f32.mrf.mxu1 }
 0x201   : > { %v1069_v4 = vadd.f32 %v1724_v3, %v2282_v24  ;;  %v1371_v61 = vadd.f32 %v1744_v21, %v2282_v24 }
 0x202   : > { %v1063_v6 = vpop.f32.mrf.mxu0  ;;  %v1365_v7 = vpop.f32.mrf.mxu1 }
 0x203   : > { %1560 = vst.msk [vmem:[%s2287_s6 + $0xb8] sm:$0xff] %vm300_vm0, %v1069_v4  ;;  %1613 = vst.msk [vmem:[%s2287_s6 + $0xf8] sm:$0xff] %vm300_vm0, %v1371_v61  ;;  %v1064_v8 = vadd.f32 %v2282_v24, %v1063_v6  ;;  %v1366_v9 = vadd.f32 %v2282_v24, %v1365_v7 }
 0x205   : > { %1559 = vst.msk [vmem:[%s2287_s6 + $0xb0] sm:$0xff] %vm300_vm0, %v1064_v8  ;;  %1612 = vst.msk [vmem:[%s2287_s6 + $0xf0] sm:$0xff] %vm300_vm0, %v1366_v9 }
 0x206 PF: > { %s13_s12 = sadd.s32 1, %s1763_s12  }
 0x207   : > { %p10_p4 = scmp.ge.s32.totalorder %s13_s12, 4  }
 0x209   :  { %12 = sbr.rel (!%p10_p4) target bundleno = 1 (0x1), region = 70 }

</bundles_post_ra>
